<compile_context>
chip_gen: v7x
topology: tpu7x:2x2x1
jax: 0.10.0
libtpu: 0.0.40
codegen_flags: <defaults>
</compile_context>

<pallas_src>
import functools

import jax
import jax.numpy as jnp
from jax.experimental import pallas as pl
from jax.experimental.pallas import tpu as pltpu


def _gru_cell_kernel(h_ref, d_ref, wh_ref, wd_ref, b_ref, out_ref, *, deter_dim):
    # h_ref:  (Bt, H)      hidden-state tile
    # d_ref:  (Bt, D)      deterministic-state tile
    # wh_ref: (H, 3D)      weight rows for hidden  (VMEM-resident)
    # wd_ref: (D, 3D)      weight rows for deter   (VMEM-resident)
    # b_ref:  (1, 3D)      bias with update_bias already folded in
    # out_ref:(Bt, D)
    compute_dtype = wh_ref.dtype
    h = h_ref[...].astype(compute_dtype)
    d = d_ref[...].astype(compute_dtype)

    parts = (
        jnp.dot(h, wh_ref[...], preferred_element_type=jnp.float32)
        + jnp.dot(d, wd_ref[...], preferred_element_type=jnp.float32)
        + b_ref[...].astype(jnp.float32)
    )  # (Bt, 3D), f32

    D = deter_dim
    reset = jax.nn.sigmoid(parts[:, 0 * D:1 * D])
    cand = jnp.tanh(reset * parts[:, 1 * D:2 * D])        # act = 'Tanh'
    update = jax.nn.sigmoid(parts[:, 2 * D:3 * D])        # bias already includes update_bias

    d_f32 = d_ref[...].astype(jnp.float32)
    out = d_f32 + update * (cand - d_f32)                 # == u*c + (1-u)*d
    out_ref[...] = out.astype(out_ref.dtype)


def prepare_gru_params(weight_t, bias, *, hidden_dim, update_bias=-1.0, weight_dtype=None):
    """One-time parameter prep (do this at init, not per step).

    weight_t: (H + D, 3D)  -- PyTorch weight (3D, H+D) transposed.
    bias:     (3D,)
    Returns (w_h, w_d, bias2d) with update_bias folded into the update gate bias.
    """
    H = hidden_dim
    total, threeD = weight_t.shape
    D = total - H
    assert threeD == 3 * D and bias.shape == (3 * D,)

    bias_f32 = bias.astype(jnp.float32)
    bias_f32 = bias_f32.at[2 * D:].add(jnp.float32(update_bias))
    bias2d = bias_f32.reshape(1, 3 * D)

    w_h = weight_t[:H, :]
    w_d = weight_t[H:, :]
    if weight_dtype is not None:
        w_h = w_h.astype(weight_dtype)
        w_d = w_d.astype(weight_dtype)
        bias2d = bias2d.astype(jnp.float32)  # bias add stays f32
    return w_h, w_d, bias2d


def _pick_batch_tile(B, requested=None):
    bt = B if requested is None else requested
    bt = min(bt, 256, B)
    if bt >= B:
        return B                      # full batch in one block (legal: equals dim)
    return max(8, (bt // 8) * 8)      # otherwise keep it a multiple of 8


def gru_cell_forward_prepared(hidden_state, deter_state, w_h, w_d, bias2d, *,
                              batch_tile=None, donate_deter=False):
    """hidden_state: (B, H), deter_state: (B, D), w_h: (H, 3D), w_d: (D, 3D), bias2d: (1, 3D)."""
    B, H = hidden_state.shape
    _, D = deter_state.shape
    assert w_h.shape == (H, 3 * D) and w_d.shape == (D, 3 * D) and bias2d.shape == (1, 3 * D)

    Bt = _pick_batch_tile(B, batch_tile)
    grid = (pl.cdiv(B, Bt),)

    # VMEM budget: resident weights + double-buffered activation tiles.
    w_bytes = w_h.size * w_h.dtype.itemsize + w_d.size * w_d.dtype.itemsize + bias2d.nbytes
    act_bytes = 2 * (Bt * H + 2 * Bt * D) * 4 + Bt * 3 * D * 4
    vmem_limit = int(min(max(2 * (w_bytes + act_bytes), 32 * 1024 * 1024), 64 * 1024 * 1024))

    cost = pl.CostEstimate(
        flops=2 * B * (H + D) * 3 * D,
        transcendentals=3 * B * D,
        bytes_accessed=(hidden_state.nbytes + deter_state.nbytes + w_bytes
                        + B * D * deter_state.dtype.itemsize),
    )

    kernel = functools.partial(_gru_cell_kernel, deter_dim=D)

    out = pl.pallas_call(
        kernel,
        out_shape=jax.ShapeDtypeStruct((B, D), deter_state.dtype),
        grid=grid,
        in_specs=[
            pl.BlockSpec((Bt, H), lambda i: (i, 0)),        # hidden tile
            pl.BlockSpec((Bt, D), lambda i: (i, 0)),        # deter tile
            pl.BlockSpec((H, 3 * D), lambda i: (0, 0)),     # w_h, VMEM-resident
            pl.BlockSpec((D, 3 * D), lambda i: (0, 0)),     # w_d, VMEM-resident
            pl.BlockSpec((1, 3 * D), lambda i: (0, 0)),     # bias, VMEM-resident
        ],
        out_specs=pl.BlockSpec((Bt, D), lambda i: (i, 0)),
        compiler_params=pltpu.CompilerParams(
            dimension_semantics=("parallel",),
            vmem_limit_bytes=vmem_limit,
        ),
        cost_estimate=cost,
        input_output_aliases=({1: 0} if donate_deter else {}),
    )(hidden_state, deter_state, w_h, w_d, bias2d)

    return out, out  # module returns (output, output)


def gru_cell_forward(hidden_state, deter_state, weight_t, bias, *,
                     update_bias=-1.0, weight_dtype=None, batch_tile=None,
                     donate_deter=False):
    """Convenience wrapper: preps params then calls the kernel (prep once in real use)."""
    H = hidden_state.shape[-1]
    w_h, w_d, bias2d = prepare_gru_params(
        weight_t, bias, hidden_dim=H, update_bias=update_bias, weight_dtype=weight_dtype)
    return gru_cell_forward_prepared(
        hidden_state, deter_state, w_h, w_d, bias2d,
        batch_tile=batch_tile, donate_deter=donate_deter)


def _reference(hidden_state, deter_state, weight_t, bias, update_bias=-1.0):
    """Pure-JAX reference mirroring the PyTorch forward."""
    D = deter_state.shape[-1]
    concat = jnp.concatenate([hidden_state, deter_state], axis=-1)
    parts = concat @ weight_t + bias
    reset, cand, update = parts[:, :D], parts[:, D:2 * D], parts[:, 2 * D:]
    reset = jax.nn.sigmoid(reset)
    cand = jnp.tanh(reset * cand)
    update = jax.nn.sigmoid(update + update_bias)
    return update * cand + (1 - update) * deter_state


if __name__ == "__main__":
    # Shapes consistent with the module's constructor:
    # deterministic_state_dim = 32, hidden_state_dim = 32, batch = 8
    B, H, D = 8, 32, 32
    key = jax.random.PRNGKey(0)
    k1, k2, k3, k4 = jax.random.split(key, 4)

    hidden_state = jax.random.normal(k1, (B, H), dtype=jnp.float32)
    deter_state = jax.random.normal(k2, (B, D), dtype=jnp.float32)

    # nn.Linear-style init: uniform(-1/sqrt(fan_in), 1/sqrt(fan_in)).
    fan_in = H + D
    bound = 1.0 / jnp.sqrt(jnp.float32(fan_in))
    # PyTorch weight is (3D, H+D); store transposed (H+D, 3D) for the kernel.
    weight_t = jax.random.uniform(k3, (H + D, 3 * D), dtype=jnp.float32,
                                  minval=-bound, maxval=bound)
    bias = jax.random.uniform(k4, (3 * D,), dtype=jnp.float32,
                              minval=-bound, maxval=bound)

    ref = _reference(hidden_state, deter_state, weight_t, bias, update_bias=-1.0)

    # f32 path (exact check against reference).
    out, out2 = gru_cell_forward(hidden_state, deter_state, weight_t, bias,
                                 update_bias=-1.0)
    jax.block_until_ready(out)
    assert out.shape == (B, D)
    assert jnp.allclose(out, ref, atol=1e-5, rtol=1e-5), "f32 mismatch vs reference"
    assert jnp.array_equal(out, out2)

    # bf16-weight path (f32 accumulation + f32 gate math), loose tolerance.
    out_bf16, _ = gru_cell_forward(hidden_state, deter_state, weight_t, bias,
                                   update_bias=-1.0, weight_dtype=jnp.bfloat16)
    jax.block_until_ready(out_bf16)
    assert jnp.allclose(out_bf16, ref, atol=1e-1, rtol=1e-1), "bf16 mismatch vs reference"

    # Larger batch exercising the batch grid (grid > 1) + pipelining.
    B2 = 64
    kb1, kb2 = jax.random.split(jax.random.PRNGKey(1))
    h2 = jax.random.normal(kb1, (B2, H), dtype=jnp.float32)
    d2 = jax.random.normal(kb2, (B2, D), dtype=jnp.float32)
    out_big, _ = gru_cell_forward(h2, d2, weight_t, bias, update_bias=-1.0,
                                  batch_tile=16)
    jax.block_until_ready(out_big)
    ref_big = _reference(h2, d2, weight_t, bias, update_bias=-1.0)
    assert jnp.allclose(out_big, ref_big, atol=1e-5, rtol=1e-5), "tiled mismatch vs reference"

    print("KERNEL_OK")
</pallas_src>

<mosaic_0001>
module attributes {stable_mosaic.version = 11 : i64} {
  func.func @_gru_cell_kernel(%arg0: i32, %arg1: memref<8x32xf32, #tpu.memory_space<vmem>>, %arg2: memref<8x32xf32, #tpu.memory_space<vmem>>, %arg3: memref<32x96xf32, #tpu.memory_space<vmem>>, %arg4: memref<32x96xf32, #tpu.memory_space<vmem>>, %arg5: memref<1x96xf32, #tpu.memory_space<vmem>>, %arg6: memref<8x32xf32, #tpu.memory_space<vmem>>) attributes {dimension_semantics = [#tpu.dimension_semantics<parallel>], iteration_bounds = array<i64: 1>, scalar_prefetch = 0 : i64, scratch_operands = 0 : i64, tpu.core_type = #tpu.core_type<tc>, window_params = [{transform_indices = @transform_0, window_bounds = array<i64: 8, 32>}, {transform_indices = @transform_1, window_bounds = array<i64: 8, 32>}, {pipeline_mode = #tpu.pipeline_mode<synchronous>, transform_indices = @transform_2, window_bounds = array<i64: 32, 96>}, {pipeline_mode = #tpu.pipeline_mode<synchronous>, transform_indices = @transform_3, window_bounds = array<i64: 32, 96>}, {pipeline_mode = #tpu.pipeline_mode<synchronous>, transform_indices = @transform_4, window_bounds = array<i64: 1, 96>}, {transform_indices = @transform_5, window_bounds = array<i64: 8, 32>}]} {
    %c0 = arith.constant 0 : index
    %c0_0 = arith.constant 0 : index
    %0 = vector.load %arg1[%c0, %c0_0] : memref<8x32xf32, #tpu.memory_space<vmem>>, vector<8x32xf32>
    %c0_1 = arith.constant 0 : index
    %c0_2 = arith.constant 0 : index
    %1 = vector.load %arg2[%c0_1, %c0_2] : memref<8x32xf32, #tpu.memory_space<vmem>>, vector<8x32xf32>
    %c0_3 = arith.constant 0 : index
    %c0_4 = arith.constant 0 : index
    %2 = vector.load %arg3[%c0_3, %c0_4] : memref<32x96xf32, #tpu.memory_space<vmem>>, vector<32x96xf32>
    %cst = arith.constant dense<0.000000e+00> : vector<8x96xf32>
    %3 = tpu.matmul %0, %2, %cst {dimension_numbers = #tpu.dot_dimension_numbers<[1], [0], [0], [1], [0, 0, 1, 1], [], []>} : vector<8x32xf32>, vector<32x96xf32>, vector<8x96xf32> -> vector<8x96xf32>
    %c0_5 = arith.constant 0 : index
    %c0_6 = arith.constant 0 : index
    %4 = vector.load %arg4[%c0_5, %c0_6] : memref<32x96xf32, #tpu.memory_space<vmem>>, vector<32x96xf32>
    %cst_7 = arith.constant dense<0.000000e+00> : vector<8x96xf32>
    %5 = tpu.matmul %1, %4, %cst_7 {dimension_numbers = #tpu.dot_dimension_numbers<[1], [0], [0], [1], [0, 0, 1, 1], [], []>} : vector<8x32xf32>, vector<32x96xf32>, vector<8x96xf32> -> vector<8x96xf32>
    %6 = arith.addf %3, %5 : vector<8x96xf32>
    %c0_8 = arith.constant 0 : index
    %c0_9 = arith.constant 0 : index
    %7 = vector.load %arg5[%c0_8, %c0_9] : memref<1x96xf32, #tpu.memory_space<vmem>>, vector<1x96xf32>
    %8 = vector.broadcast %7 : vector<1x96xf32> to vector<8x96xf32>
    %9 = arith.addf %6, %8 : vector<8x96xf32>
    %10 = vector.extract_strided_slice %9 {offsets = [0, 0], sizes = [8, 32], strides = [1, 1]} : vector<8x96xf32> to vector<8x32xf32>
    %11 = arith.negf %10 : vector<8x32xf32>
    %12 = math.exp %11 : vector<8x32xf32>
    %cst_10 = arith.constant 1.000000e+00 : f32
    %13 = vector.broadcast %cst_10 : f32 to vector<8x32xf32>
    %14 = arith.addf %13, %12 : vector<8x32xf32>
    %15 = arith.divf %13, %14 : vector<8x32xf32>
    %16 = vector.extract_strided_slice %9 {offsets = [0, 32], sizes = [8, 32], strides = [1, 1]} : vector<8x96xf32> to vector<8x32xf32>
    %17 = arith.mulf %15, %16 : vector<8x32xf32>
    %18 = math.tanh %17 : vector<8x32xf32>
    %19 = vector.extract_strided_slice %9 {offsets = [0, 64], sizes = [8, 32], strides = [1, 1]} : vector<8x96xf32> to vector<8x32xf32>
    %20 = arith.negf %19 : vector<8x32xf32>
    %21 = math.exp %20 : vector<8x32xf32>
    %cst_11 = arith.constant 1.000000e+00 : f32
    %22 = vector.broadcast %cst_11 : f32 to vector<8x32xf32>
    %23 = arith.addf %22, %21 : vector<8x32xf32>
    %24 = arith.divf %22, %23 : vector<8x32xf32>
    %c0_12 = arith.constant 0 : index
    %c0_13 = arith.constant 0 : index
    %25 = vector.load %arg2[%c0_12, %c0_13] : memref<8x32xf32, #tpu.memory_space<vmem>>, vector<8x32xf32>
    %26 = arith.subf %18, %25 : vector<8x32xf32>
    %27 = arith.mulf %24, %26 : vector<8x32xf32>
    %28 = arith.addf %25, %27 : vector<8x32xf32>
    %c0_14 = arith.constant 0 : index
    %c0_15 = arith.constant 0 : index
    %29 = vector.load %arg6[%c0_14, %c0_15] : memref<8x32xf32, #tpu.memory_space<vmem>>, vector<8x32xf32>
    tpu.vector_store %arg6[%c0_14, %c0_15], %28 {strides = array<i32>} : memref<8x32xf32, #tpu.memory_space<vmem>>, vector<8x32xf32>,
    return
  }
  func.func @transform_0(%arg0: i32) -> (i32, i32) {
    %c0_i32 = arith.constant 0 : i32
    %c0_i32_0 = arith.constant 0 : i32
    return %arg0, %c0_i32 : i32, i32
  }
  func.func @transform_1(%arg0: i32) -> (i32, i32) {
    %c0_i32 = arith.constant 0 : i32
    %c0_i32_0 = arith.constant 0 : i32
    return %arg0, %c0_i32 : i32, i32
  }
  func.func @transform_2(%arg0: i32) -> (i32, i32) {
    %c0_i32 = arith.constant 0 : i32
    %c0_i32_0 = arith.constant 0 : i32
    %c0_i32_1 = arith.constant 0 : i32
    return %c0_i32, %c0_i32_0 : i32, i32
  }
  func.func @transform_3(%arg0: i32) -> (i32, i32) {
    %c0_i32 = arith.constant 0 : i32
    %c0_i32_0 = arith.constant 0 : i32
    %c0_i32_1 = arith.constant 0 : i32
    return %c0_i32, %c0_i32_0 : i32, i32
  }
  func.func @transform_4(%arg0: i32) -> (i32, i32) {
    %c0_i32 = arith.constant 0 : i32
    %c0_i32_0 = arith.constant 0 : i32
    %c0_i32_1 = arith.constant 0 : i32
    return %c0_i32, %c0_i32_0 : i32, i32
  }
  func.func @transform_5(%arg0: i32) -> (i32, i32) {
    %c0_i32 = arith.constant 0 : i32
    %c0_i32_0 = arith.constant 0 : i32
    return %arg0, %c0_i32 : i32, i32
  }
}

</mosaic_0001>

<bundles_post_ra>
// kernel: tpu_custom_call.1
= control target key start
LH: loop header
LB: loop body
LE: loop exit
PB: predicated region body
PF: predicated region fallthrough
CT: control target
= control target key end

     0   :  { %10 = vsyncpa [#allocation3], 0  ;;  %s570_s0 = inlined_call_operand.hbm [shape: f32[8,32], index: 0, kind: input, shape index: {}]   ;;  %s571_s1 = inlined_call_operand.hbm [shape: f32[8,32], index: 1, kind: input, shape index: {}]   ;;  %s572_s2 = inlined_call_operand.hbm [shape: f32[32,96], index: 2, kind: input, shape index: {}]   ;;  %s573_s3 = inlined_call_operand.hbm [shape: f32[32,96], index: 3, kind: input, shape index: {}]   ;;  %s574_s4 = inlined_call_operand.vmem [shape: f32[1,96], index: 4, kind: input, shape index: {}]   ;;  %s575_s5 = inlined_call_operand.hbm [shape: f32[8,32], index: 5, kind: output, shape index: {}]  }
   0x1   :  { %11 = vsyncpa [#allocation6], 0 }
   0x2   :  { %12 = vsyncpa [#allocation9], 0 }
   0x3   :  { %13 = vsyncpa [#allocation4], 0  ;;  %s462_s18 = smov [#allocation5]   ;;  %s463_s20 = smov [#allocation2]  }
   0x4   :  { %s30_s19 = sshll.u32 %s462_s18, 4  ;;  %s20_s21 = sshll.u32 %s463_s20, 4  ;;  %s31_s19 = int_to_ptr.vmem [resolvable:$true] %s30_s19  ;;  %s21_s21 = int_to_ptr.vmem [resolvable:$true] %s20_s21 }
   0x5   :  { %s344_s24 = scalar_lea.hbm %s571_s1, 128 }
   0x6   :  { %p345_p0 = scmp.ne.s32.totalorder %s571_s1, %s344_s24  ;;  %p348_p1 = scmp.lt.u32.totalorder %s344_s24, %s571_s1 }
   0x8   :  { %p350_p2 = pnand %p348_p1, %p345_p0 }
   0xa   :  { %353 = shalt.err (!%p350_p2)
}
   0xb   :  { %s354_s29 = scalar_lea.vmem %s31_s19, 128  ;;  %p359_p4 = scmp.lt.s32.totalorder %s31_s19, %s31_s19 }
   0xc   :  { %p355_p3 = scmp.ne.s32.totalorder %s31_s19, %s354_s29  ;;  %p360_p5 = scmp.lt.s32.totalorder %s354_s29, %s354_s29 }
   0xe   :  { %p361_p6 = por %p360_p5, %p359_p4 }
  0x10   :  { %p362_p7 = pnand %p361_p6, %p355_p3 }
  0x12   :  { %365 = shalt.err (!%p362_p7)
}
  0x13   :  { %33 = dma.hbm_to_vmem [thread:$0]  %s571_s1, 128, %s31_s19, [#allocation6]  }
  0x14   :  { %s366_s9 = scalar_lea.hbm %s570_s0, 128 }
  0x15   :  { %p367_p8 = scmp.ne.s32.totalorder %s570_s0, %s366_s9  ;;  %p370_p9 = scmp.lt.u32.totalorder %s366_s9, %s570_s0 }
  0x17   :  { %p372_p10 = pnand %p370_p9, %p367_p8 }
  0x19   :  { %375 = shalt.err (!%p372_p10)
}
  0x1a   :  { %s376_s14 = scalar_lea.vmem %s21_s21, 128  ;;  %p381_p12 = scmp.lt.s32.totalorder %s21_s21, %s21_s21 }
  0x1b   :  { %p377_p11 = scmp.ne.s32.totalorder %s21_s21, %s376_s14  ;;  %p382_p13 = scmp.lt.s32.totalorder %s376_s14, %s376_s14 }
  0x1d   :  { %p383_p0 = por %p382_p13, %p381_p12 }
  0x1f   :  { %p384_p1 = pnand %p383_p0, %p377_p11 }
  0x21   :  { %387 = shalt.err (!%p384_p1)
}
  0x22   :  { %23 = dma.hbm_to_vmem [thread:$0]  %s570_s0, 128, %s21_s21, [#allocation3]  }
  0x23   :  { %s464_s16 = smov [#allocation7]   ;;  %s388_s20 = scalar_lea.hbm %s572_s2, 512 }
  0x24   :  { %s39_s17 = sshll.u32 %s464_s16, 4  ;;  %p389_p2 = scmp.ne.s32.totalorder %s572_s2, %s388_s20  ;;  %s40_s17 = int_to_ptr.vmem [resolvable:$true] %s39_s17 }
  0x25   :  { %p392_p3 = scmp.lt.u32.totalorder %s388_s20, %s572_s2 }
  0x27   :  { %p394_p4 = pnand %p392_p3, %p389_p2 }
  0x29   :  { %397 = shalt.err (!%p394_p4)
}
  0x2a   :  { %s398_s26 = scalar_lea.vmem %s40_s17, 512  ;;  %p403_p6 = scmp.lt.s32.totalorder %s40_s17, %s40_s17 }
  0x2b   :  { %p399_p5 = scmp.ne.s32.totalorder %s40_s17, %s398_s26  ;;  %p404_p7 = scmp.lt.s32.totalorder %s398_s26, %s398_s26 }
  0x2d   :  { %p405_p8 = por %p404_p7, %p403_p6 }
  0x2f   :  { %p406_p9 = pnand %p405_p8, %p399_p5 }
  0x31   :  { %409 = shalt.err (!%p406_p9)
}
  0x32   :  { %s465_s0 = smov 128   ;;  %s466_s21 = smov 8  }
  0x33   :  { %45 = dma.hbm_to_vmem [thread:$0]  %s572_s2, 512, %s40_s17, [#allocation6], %s465_s0, %s465_s0, %s466_s21  }
  0x34   :  { %s467_s29 = smov [#allocation8]   ;;  %s410_s8 = scalar_lea.hbm %s573_s3, 512 }
  0x35   :  { %s51_s30 = sshll.u32 %s467_s29, 4  ;;  %p411_p10 = scmp.ne.s32.totalorder %s573_s3, %s410_s8  ;;  %s52_s30 = int_to_ptr.vmem [resolvable:$true] %s51_s30 }
  0x36   :  { %p414_p11 = scmp.lt.u32.totalorder %s410_s8, %s573_s3 }
  0x38   :  { %p416_p12 = pnand %p414_p11, %p411_p10 }
  0x3a   :  { %419 = shalt.err (!%p416_p12)
}
  0x3b   :  { %s420_s13 = scalar_lea.vmem %s52_s30, 512  ;;  %p425_p0 = scmp.lt.s32.totalorder %s52_s30, %s52_s30 }
  0x3c   :  { %p421_p13 = scmp.ne.s32.totalorder %s52_s30, %s420_s13  ;;  %p426_p1 = scmp.lt.s32.totalorder %s420_s13, %s420_s13 }
  0x3e   :  { %p427_p2 = por %p426_p1, %p425_p0 }
  0x40   :  { %p428_p3 = pnand %p427_p2, %p421_p13 }
  0x42   :  { %431 = shalt.err (!%p428_p3)
}
  0x43   :  { %57 = dma.hbm_to_vmem [thread:$0]  %s573_s3, 512, %s52_s30, [#allocation9], %s465_s0, %s465_s0, %s466_s21  }
  0x44   :  { %454 = dma.done.wait [#allocation3], 128  }
  0x45   :  { %455 = vsyncadd [#allocation3], 4294967168 }
  0x46   :  { %456 = dma.done.wait [#allocation6], 640  }
  0x47   :  { %457 = vsyncadd [#allocation6], 4294966656 }
  0x48   :  { %458 = dma.done.wait [#allocation9], 512  }
  0x49   :  { %459 = vsyncadd [#allocation9], 4294966784  ;;  %v468_v0 = vmov 0.0|0.0   ;;  %vm469_vm0 = vmmov 0   ;;  %v470_v1 = vmov 0.0   ;;  %v78_v2 = vld [vmem:[#allocation8] sm:$0xff] }
  0x4a   :  { %314 = vmatprep.subr.bf16.mxu0 %v468_v0  ;;  %320 = vmatprep.subr.bf16.mxu1 %v468_v0  ;;  %v79_v3 = vld [vmem:[#allocation8 + $0x8] sm:$0xff]  ;;  %v74_v4 = vld [vmem:[#allocation7] sm:$0xff]  ;;  %v80_v7 = vld [vmem:[#allocation8 + $0x10] sm:$0xff]  ;;  %vm82_vm1 = vcmask 261120   ;;  %s471_s15 = smov 96   ;;  %s472_s16 = smov 64  }
  0x4b   :  { %300 = vmatprep.mubr.msk.f32.mxu0 %vm469_vm0, %v470_v1  ;;  %311 = vmatprep.mubr.msk.f32.mxu1 %vm469_vm0, %v470_v1  ;;  %v315_v5 = vpack.c.bf16 %v79_v3, %v78_v2  ;;  %v75_v6 = vld [vmem:[#allocation7 + $0x8] sm:$0xff]  ;;  %v81_v8 = vld [vmem:[#allocation8 + $0x18] sm:$0xff]  ;;  %v76_v10 = vld [vmem:[#allocation7 + $0x10] sm:$0xff] }
  0x4c   :  { %v321_v9 = vpack.c.bf16 %v75_v6, %v74_v4  ;;  %v77_v11 = vld [vmem:[#allocation7 + $0x18] sm:$0xff]  ;;  %v318_v12 = vpack.c.bf16 %v81_v8, %v80_v7  ;;  %v72_v15 = vld [vmem:[#allocation2] sm:$0xff] }
  0x4d   :  { %316 = vmatpush3.bf16.msra.mxu0 %v315_v5  ;;  %v324_v13 = vpack.c.bf16 %v77_v11, %v76_v10  ;;  %v73_v14 = vld [vmem:[#allocation5] sm:$0xff]  ;;  %v280_v19 = vld [vmem:[%s574_s4] ss:$0 sm:$0xff]  ;;  %s473_s4 = smov [#allocation10]  }
  0x4e   :  { %322 = vmatpush3.bf16.msra.mxu1 %v321_v9  ;;  %317 = vmatprep.subr.bf16.mxu0 %v468_v0  ;;  %s267_s17 = sshll.u32 %s473_s4, 4  ;;  %s268_s17 = int_to_ptr.vmem [resolvable:$true] %s267_s17 }
  0x4f   :  { %323 = vmatprep.subr.bf16.mxu1 %v468_v0  ;;  %s432_s18 = scalar_lea.vmem %s268_s17, 128  ;;  %p437_p5 = scmp.lt.s32.totalorder %s268_s17, %s268_s17 }
  0x50   :  { %p433_p4 = scmp.ne.s32.totalorder %s268_s17, %s432_s18  ;;  %p438_p6 = scmp.lt.s32.totalorder %s432_s18, %s432_s18 }
  0x51   :  { %319 = vmatpush3.bf16.msra.mxu0 %v318_v12 }
  0x52   :  { %325 = vmatpush3.bf16.msra.mxu1 %v324_v13  ;;  %p439_p7 = por %p438_p6, %p437_p5 }
  0x54   :  { %301 = vmatmul.mubr.msk.f32.vlgmr.msra.gmra.mrb[0].mxu0 %vm82_vm1, %v73_v14  ;;  %p440_p8 = pnand %p439_p7, %p433_p4 }
  0x55   :  { %312 = vmatmul.mubr.msk.f32.vlgmr.msra.gmra.mrb[0].mxu1 %vm82_vm1, %v72_v15 }
 0x127   :  { %v152_v16 = vpop.f32.mrb[0].mxu0 }
 0x128   :  { %v225_v17 = vpop.f32.mrb[0].mxu1  ;;  %v302_v18 = vpop.f32.mrb[1].mxu0 }
 0x129   :  { %v226_v20 = vadd.f32 %v225_v17, %v152_v16  ;;  %v313_v21 = vpop.f32.mrb[1].mxu1 }
 0x12b   :  { %v236_v22 = vadd.f32 %v280_v19, %v226_v20 }
 0x12d   :  { %244 = vrot.lane.b32.xlu0 %v236_v22, %s471_s15  ;;  %v281_v23 = vmul.f32 -1.442695, %v236_v22 }
 0x12f   :  { %338 = vpow2.f32 %v281_v23 }
 0x139   :  { %v339_v24 = vpop.eup %338 }
 0x13a   :  { %v240_v25 = vadd.f32 1.0, %v339_v24 }
 0x13c   :  { %340 = vrcp.f32 %v240_v25 }
 0x146   :  { %v341_v26 = vpop.eup %340 }
 0x19f   :  { %v245_v27 = vpop.permute.xlu0 %244 }
 0x1a0   :  { %v247_v28 = vmul.f32 %v341_v26, %v245_v27 }
 0x1a2   :  { %342 = vtanh.f32 %v247_v28 }
 0x1ac   :  { %v343_v29 = vpop.eup %342 }
 0x1ad   :  { %v249_v30 = vsub.f32 %v343_v29, %v73_v14 }
 0x1af   :  { %251 = vrot.lane.b32.xlu0 %v249_v30, %s472_s16 }
 0x221   :  { %v252_v31 = vpop.permute.xlu0 %251 }
 0x222   :  { %v254_v32 = vmul.f32 %v341_v26, %v252_v31 }
 0x224   :  { %256 = vrot.lane.b32.xlu1 %v254_v32, %s472_s16 }
 0x296   :  { %v257_v33 = vpop.permute.xlu1 %256 }
 0x297   :  { %v259_v34 = vadd.f32 %v257_v33, %v73_v14 }
 0x299   :  { %260 = vst.msk [vmem:[#allocation10] sm:$0xff] %vm82_vm1, %v259_v34 }
 0x29a   :  { %443 = shalt.err (!%p440_p8)
}
 0x29b   :  { %s444_s22 = scalar_lea.hbm %s575_s5, 128 }
 0x29c   :  { %p445_p9 = scmp.ne.s32.totalorder %s575_s5, %s444_s22  ;;  %p448_p10 = scmp.lt.u32.totalorder %s444_s22, %s575_s5 }
 0x29e   :  { %p450_p11 = pnand %p448_p10, %p445_p9 }
 0x2a0   :  { %453 = shalt.err (!%p450_p11)
}
 0x2a1   :  { %270 = dma.vmem_to_hbm [thread:$0]  %s268_s17, 128, %s575_s5, [#allocation4]  }
 0x2a2   :  { %460 = dma.done.wait [#allocation4], 128  }
 0x2a3   :  { %461 = vsyncadd [#allocation4], 4294967168 }
 0x2a4   :  { %274 = vsyncpa [#allocation3], 1 }
 0x2a5   :  { %275 = vsyncpa [#allocation6], 1 }
 0x2a6   :  { %276 = vsyncpa [#allocation9], 1 }
 0x2a7   :  { %277 = vsyncpa [#allocation4], 1 }

</bundles_post_ra>
